<compile_context>
chip_gen: v5e
topology: v5e:2x2
jax: 0.10.0
libtpu: 0.0.40
codegen_flags: <defaults>
</compile_context>

<pallas_src>
import jax
import jax.numpy as jnp
from jax.experimental import pallas as pl
from jax.experimental.pallas import tpu as pltpu


def _round_up(n, m):
    return ((n + m - 1) // m) * m


def _vmem_capacity_bytes():
    try:
        return int(pltpu.get_tpu_info().vmem_capacity_bytes)
    except Exception:
        return 64 * 1024 * 1024  # conservative fallback (v7x per-TC physical VMEM)


def classifier_kernel(x_ref, w_ref, b_ref, o_ref):
    # x_ref: (TB, C, HW)  native dtype -- channels on sublanes, spatial on lanes
    # w_ref: (C, NCp)     f32, already scaled by 1/HW
    # b_ref: (1, NCp)     f32
    # o_ref: (TB, NCp)    f32
    # AdaptiveAvgPool2d((1,1)): sum over the spatial (lane) axis; the 1/HW scale is
    # folded into the weight at trace time, so no per-step VPU multiply here.
    pooled = jnp.sum(x_ref[...], axis=2, dtype=jnp.float32)  # (TB, C) f32
    out = jnp.dot(pooled, w_ref[...], preferred_element_type=jnp.float32)  # (TB, NCp)
    o_ref[...] = out + b_ref[...]


def _pick_batch_tile(B, row_bytes, out_row_bytes, fixed_bytes, vmem_cap):
    # x and out blocks are double-buffered by the BlockSpec pipeline; keep the total
    # allocation at <= ~75% of physical VMEM (weight/bias counted in fixed_bytes).
    usable = int(vmem_cap * 0.75) - fixed_bytes
    per_row = 2 * (row_bytes + out_row_bytes)
    tb = max(1, usable // max(1, per_row))
    # Prefer >= 2 grid steps when the batch is big enough (keeps tiles a multiple of
    # 8) so the "parallel" batch axis shards across both v7x TensorCores and the
    # pipeline actually overlaps DMA with compute.
    if B >= 16:
        tb = min(tb, -(-B // 2))
    if tb >= B:
        return B
    tb8 = (tb // 8) * 8
    if tb8 == 0:
        # A single batch row alone exceeds the budget; use the smallest legal partial
        # tile instead of silently inflating further.
        # TODO(synk): for very large C*H*W, add an 'arbitrary' grid axis over HW and
        # accumulate the pooled sum across it instead of enlarging the x block.
        return B if B <= 8 else 8
    return min(tb8, B)


def classifier_forward(x_nchw, weight, bias):
    """x_nchw: (B, C, H, W); weight: (n_classes, C); bias: (n_classes,). f32 logits."""
    B, C, H, W = x_nchw.shape
    n_classes = weight.shape[0]
    HW = H * W
    NCp = _round_up(n_classes, 128)

    # Free reshape: NCHW -> (B, C, HW). No transpose, no extra HBM traffic on x.
    x_bchw = x_nchw.reshape(B, C, HW)

    # Weight prep (tiny, done once at trace time): f32 cast, fold 1/HW pooling scale,
    # transpose to (C, NCp) so the kernel contracts as plain (M,K)x(K,N).
    w_t = (weight.astype(jnp.float32) * (1.0 / HW)).T          # (C, n_classes)
    w_t = jnp.pad(w_t, ((0, 0), (0, NCp - n_classes)))          # (C, NCp)
    b_pad = jnp.pad(bias.astype(jnp.float32), (0, NCp - n_classes)).reshape(1, NCp)

    itemsize = jnp.dtype(x_bchw.dtype).itemsize
    row_bytes = C * HW * itemsize
    out_row_bytes = NCp * 4
    # Weight + bias may be double-buffered even though grid-invariant; budget for it.
    fixed_bytes = 2 * (C * NCp * 4) + 2 * (8 * NCp * 4)

    vmem_cap = _vmem_capacity_bytes()
    TB = _pick_batch_tile(B, row_bytes, out_row_bytes, fixed_bytes, vmem_cap)
    grid = (pl.cdiv(B, TB),)

    vmem_needed = 2 * TB * row_bytes + 2 * TB * out_row_bytes + fixed_bytes + (2 << 20)
    vmem_limit = int(min(vmem_cap, max(32 << 20, vmem_needed)))

    cost = pl.CostEstimate(
        flops=B * C * HW + 2 * B * C * NCp,
        transcendentals=0,
        bytes_accessed=B * C * HW * itemsize + C * NCp * 4 + B * NCp * 4,
    )

    out_padded = pl.pallas_call(
        classifier_kernel,
        out_shape=jax.ShapeDtypeStruct((B, NCp), jnp.float32),
        grid=grid,
        in_specs=[
            pl.BlockSpec((TB, C, HW), lambda i: (i, 0, 0)),  # batch-tiled activation
            pl.BlockSpec((C, NCp), lambda i: (0, 0)),        # resident weight
            pl.BlockSpec((1, NCp), lambda i: (0, 0)),        # resident bias
        ],
        out_specs=pl.BlockSpec((TB, NCp), lambda i: (i, 0)),
        compiler_params=pltpu.CompilerParams(
            dimension_semantics=("parallel",),
            vmem_limit_bytes=vmem_limit,
        ),
        cost_estimate=cost,
    )(x_bchw, w_t, b_pad)

    return out_padded[:, :n_classes]


classifier_forward = jax.jit(classifier_forward)


if __name__ == "__main__":
    # Small shapes consistent with the module's forward.
    B, C, H, W = 2, 4, 16, 16          # in_features = C = 4
    n_classes = 8

    key = jax.random.PRNGKey(0)
    kx, kw, kb = jax.random.split(key, 3)

    x = jax.random.normal(kx, (B, C, H, W), dtype=jnp.float32)

    # Deterministic Linear init (PyTorch-style uniform(-1/sqrt(fan_in), +...))
    bound = 1.0 / (C ** 0.5)
    weight = jax.random.uniform(kw, (n_classes, C), dtype=jnp.float32,
                                minval=-bound, maxval=bound)
    bias = jax.random.uniform(kb, (n_classes,), dtype=jnp.float32,
                              minval=-bound, maxval=bound)

    out = classifier_forward(x, weight, bias)
    out = jax.block_until_ready(out)

    # Pure-JAX reference (avgpool -> flatten -> linear)
    ref = jnp.mean(x, axis=(2, 3)) @ weight.T + bias
    assert out.shape == (B, n_classes)
    assert out.dtype == jnp.float32
    assert jnp.allclose(out, ref, atol=1e-5, rtol=1e-5)

    print("KERNEL_OK")
</pallas_src>

<mosaic_0001>
module attributes {stable_mosaic.version = 11 : i64} {
  func.func @classifier_kernel(%arg0: i32, %arg1: memref<2x4x256xf32, #tpu.memory_space<vmem>>, %arg2: memref<4x128xf32, #tpu.memory_space<vmem>>, %arg3: memref<1x128xf32, #tpu.memory_space<vmem>>, %arg4: memref<2x128xf32, #tpu.memory_space<vmem>>) attributes {dimension_semantics = [#tpu.dimension_semantics<parallel>], iteration_bounds = array<i64: 1>, scalar_prefetch = 0 : i64, scratch_operands = 0 : i64, tpu.core_type = #tpu.core_type<tc>, window_params = [{transform_indices = @transform_0, window_bounds = array<i64: 2, 4, 256>}, {pipeline_mode = #tpu.pipeline_mode<synchronous>, transform_indices = @transform_1, window_bounds = array<i64: 4, 128>}, {pipeline_mode = #tpu.pipeline_mode<synchronous>, transform_indices = @transform_2, window_bounds = array<i64: 1, 128>}, {transform_indices = @transform_3, window_bounds = array<i64: 2, 128>}]} {
    %c0 = arith.constant 0 : index
    %c0_0 = arith.constant 0 : index
    %c0_1 = arith.constant 0 : index
    %0 = vector.load %arg1[%c0, %c0_0, %c0_1] : memref<2x4x256xf32, #tpu.memory_space<vmem>>, vector<2x4x256xf32>
    %cst = arith.constant dense<0.000000e+00> : vector<2x4xf32>
    %1 = vector.multi_reduction <add>, %0, %cst [2] : vector<2x4x256xf32> to vector<2x4xf32>
    %c0_2 = arith.constant 0 : index
    %c0_3 = arith.constant 0 : index
    %2 = vector.load %arg2[%c0_2, %c0_3] : memref<4x128xf32, #tpu.memory_space<vmem>>, vector<4x128xf32>
    %cst_4 = arith.constant dense<0.000000e+00> : vector<2x128xf32>
    %3 = tpu.matmul %1, %2, %cst_4 {dimension_numbers = #tpu.dot_dimension_numbers<[1], [0], [0], [1], [0, 0, 1, 1], [], []>} : vector<2x4xf32>, vector<4x128xf32>, vector<2x128xf32> -> vector<2x128xf32>
    %c0_5 = arith.constant 0 : index
    %c0_6 = arith.constant 0 : index
    %4 = vector.load %arg3[%c0_5, %c0_6] : memref<1x128xf32, #tpu.memory_space<vmem>>, vector<1x128xf32>
    %5 = vector.broadcast %4 : vector<1x128xf32> to vector<2x128xf32>
    %6 = arith.addf %3, %5 : vector<2x128xf32>
    %c0_7 = arith.constant 0 : index
    %c0_8 = arith.constant 0 : index
    %7 = vector.load %arg4[%c0_7, %c0_8] : memref<2x128xf32, #tpu.memory_space<vmem>>, vector<2x128xf32>
    tpu.vector_store %arg4[%c0_7, %c0_8], %6 {strides = array<i32>} : memref<2x128xf32, #tpu.memory_space<vmem>>, vector<2x128xf32>,
    return
  }
  func.func @transform_0(%arg0: i32) -> (i32, i32, i32) {
    %c0_i32 = arith.constant 0 : i32
    %c0_i32_0 = arith.constant 0 : i32
    %c0_i32_1 = arith.constant 0 : i32
    return %arg0, %c0_i32, %c0_i32_0 : i32, i32, i32
  }
  func.func @transform_1(%arg0: i32) -> (i32, i32) {
    %c0_i32 = arith.constant 0 : i32
    %c0_i32_0 = arith.constant 0 : i32
    %c0_i32_1 = arith.constant 0 : i32
    return %c0_i32, %c0_i32_0 : i32, i32
  }
  func.func @transform_2(%arg0: i32) -> (i32, i32) {
    %c0_i32 = arith.constant 0 : i32
    %c0_i32_0 = arith.constant 0 : i32
    %c0_i32_1 = arith.constant 0 : i32
    return %c0_i32, %c0_i32_0 : i32, i32
  }
  func.func @transform_3(%arg0: i32) -> (i32, i32) {
    %c0_i32 = arith.constant 0 : i32
    %c0_i32_0 = arith.constant 0 : i32
    return %arg0, %c0_i32 : i32, i32
  }
}

</mosaic_0001>

<bundles_post_ra>
// kernel: classifier_forward.1
= control target key start
LH: loop header
LB: loop body
LE: loop exit
PB: predicated region body
PF: predicated region fallthrough
CT: control target
= control target key end

     0   :  { %s163_s0 = inlined_call_operand.vmem [shape: f32[2,4,256], index: 0, kind: input, shape index: {}]   ;;  %s164_s1 = inlined_call_operand.vmem [shape: f32[4,128], index: 1, kind: input, shape index: {}]   ;;  %s165_s2 = inlined_call_operand.vmem [shape: f32[1,128], index: 2, kind: input, shape index: {}]   ;;  %s166_s3 = inlined_call_operand.hbm [shape: f32[2,128], index: 3, kind: output, shape index: {}]  }
   0x1   :  { %v15_v0 = vld [vmem:[%s163_s0] sm:$0xff]  ;;  %v16_v1 = vld [vmem:[%s163_s0 + $0x8] sm:$0xff] }
   0x2   :  { %19 = vst [vmem:[#allocation1] ss:$2 sm:$0xff] %v15_v0 }
   0x3   :  { %8 = vsyncpa [#allocation3], 0  ;;  %23 = vst [vmem:[#allocation1 + $0x10] ss:$2 sm:$0xff] %v16_v1  ;;  %vm30_vm0 = vcmask 1043456   ;;  %v48_v14 = vlaneseq  ;;  %vm52_vm1 = vcmask 1041409  }
   0x4   :  { %v41_v12 = vld [vmem:[%s164_s1] sm:$0xf]  ;;  %vm54_vm2 = vcmask 31744   ;;  %s127_s19 = smov [#allocation2]   ;;  %s88_s1 = sshll.u32 %s166_s3, 4  ;;  %s89_s1 = int_to_ptr.hbm [resolvable:$true] %s88_s1 }
   0x5   :  { %97 = vmatpush.msk.msra.mxu0 %vm30_vm0, %v41_v12  ;;  %v49_v15 = vand.u32 127, %v48_v14  ;;  %v100_v20 = vld [vmem:[%s165_s2] ss:$0 sm:$0xff]  ;;  %s86_s20 = sshll.u32 %s127_s19, 4  ;;  %s87_s20 = int_to_ptr.vmem [resolvable:$true] %s86_s20 }
   0x9   :  { %v20_v2 = vld.sshfl [vmem:[#allocation1] sm:$0xff pattern:$0x75316420]  ;;  %v21_v3 = vld.sshfl [vmem:[#allocation1 + $0x8] sm:$0xff pattern:$0x75316420] }
   0xa   :  { %v31_v4 = vsel %vm30_vm0, %v20_v2, 0.0  ;;  %v32_v5 = vsel %vm30_vm0, %v21_v3, 0.0  ;;  %v24_v7 = vld.sshfl [vmem:[#allocation1 + $0x10] sm:$0xff pattern:$0x75316420] }
   0xb   :  { %v33_v6 = vadd.f32 %v32_v5, %v31_v4  ;;  %v25_v8 = vld.sshfl [vmem:[#allocation1 + $0x18] sm:$0xff pattern:$0x75316420]  ;;  %v36_v9 = vsel %vm30_vm0, %v24_v7, 0.0 }
   0xc   :  { %v37_v10 = vsel %vm30_vm0, %v25_v8, 0.0 }
   0xd   :  { %34 = vadd.xlane.f32.xlu0 %v33_v6  ;;  %v38_v11 = vadd.f32 %v37_v10, %v36_v9 }
  0x15   :  { %39 = vadd.xlane.f32.xlu0 %v38_v11 }
  0x80   :  { %v35_v13 = vpop.xlane.xlu0 %34 }
  0x81   :  { %v50_v17 = vperm.slane %v35_v13, %v49_v15 }
  0x88   :  { %v40_v16 = vpop.xlane.xlu0 %39 }
  0x89   :  { %v51_v18 = vperm.slane %v40_v16, %v49_v15 }
  0x8b   :  { %v53_v19 = vsel %vm52_vm1, %v51_v18, %v50_v17 }
  0x8c   :  { %98 = vmatmul.msk.f32.vlgmr.msra.gmra.mxu0 %vm54_vm2, %v53_v19 }
 0x109   :  { %v77_v21 = vpop.f32.mrf.mxu0 }
 0x10a   :  { %v78_v22 = vadd.f32 %v100_v20, %v77_v21 }
 0x10c   :  { %80 = vst [vmem:[#allocation2] sm:$0x3] %v78_v22 }
 0x10d   :  { %91 = dma.vmem_to_hbm [thread:$0]  %s87_s20, 32, %s89_s1, [#allocation3]  }
 0x10e   :  { %125 = dma.done.wait [#allocation3], 32  }
 0x10f   :  { %126 = vsyncadd [#allocation3], 4294967264 }
 0x110   :  { %96 = vsyncpa [#allocation3], 1 }

</bundles_post_ra>
